<compile_context>
chip_gen: v7x
topology: tpu7x:2x2x1
jax: 0.10.0
libtpu: 0.0.40
codegen_flags: <defaults>
</compile_context>

<pallas_src>
import functools

import jax
import jax.numpy as jnp
from jax.experimental import pallas as pl
from jax.experimental.pallas import tpu as pltpu


def _sam_kernel(x_ref, ximg_ref, w1_ref, b1_ref, w2_ref, b2_ref, w3_ref, b3_ref,
                x1_ref, img_ref, xs_scratch, gs_scratch, *, H, W):
    f32 = jnp.float32
    HW = H * W

    x = x_ref[...].astype(f32)        # (C, HW)   lane-dense: HW in lanes
    ximg = ximg_ref[...].astype(f32)  # (3, HW)

    # ---- boundary masks: built once, reused for x-taps and img-taps ----
    col = jax.lax.broadcasted_iota(jnp.int32, (1, HW), 1)
    wpos = col % W
    valid_w_m1 = wpos >= 1            # dw = -1 needs w-1 >= 0
    valid_w_p1 = wpos <= W - 2        # dw = +1 needs w+1 <= W-1
    valid_h_m1 = col >= W             # dh = -1 needs h-1 >= 0
    valid_h_p1 = col < (H - 1) * W    # dh = +1 needs h+1 <= H-1

    def _tap_mask(dh, dw):
        m = None
        if dh == -1:
            m = valid_h_m1
        elif dh == 1:
            m = valid_h_p1
        if dw == -1:
            m = valid_w_m1 if m is None else jnp.logical_and(m, valid_w_m1)
        elif dw == 1:
            m = valid_w_p1 if m is None else jnp.logical_and(m, valid_w_p1)
        return m

    tap_masks = [_tap_mask(t // 3 - 1, t % 3 - 1) for t in range(9)]

    def stage_taps(inp, scratch):
        # Write the 9 zero-padded 3x3-neighbour shifts of `inp` (Cin, HW)
        # into `scratch` as (9*Cin, HW), tap-major, so each conv becomes a
        # single (Cout, 9*Cin) @ (9*Cin, HW) matmul.
        cin = inp.shape[0]
        for t in range(9):
            dh, dw = t // 3 - 1, t % 3 - 1
            s = dh * W + dw
            if s == 0:
                shifted = inp
            else:
                # shifted[i] = inp[i + s] (circular); boundary mask zeroes the
                # wrapped-around / out-of-image positions => exact zero padding.
                shifted = pltpu.roll(inp, shift=(-s) % HW, axis=1)
            m = tap_masks[t]
            if m is not None:
                shifted = jnp.where(m, shifted, 0.0)
            scratch[pl.ds(t * cin, cin), :] = shifted

    # conv1(x) and conv2(x) share the staged shifted copies of x.
    stage_taps(x, xs_scratch)
    xs = xs_scratch[...]                                   # (9*C, HW)
    y1 = jnp.dot(w1_ref[...].astype(f32), xs, preferred_element_type=f32)
    y1 = y1 + b1_ref[...].astype(f32)
    y2 = jnp.dot(w2_ref[...].astype(f32), xs, preferred_element_type=f32)
    img = y2 + b2_ref[...].astype(f32) + ximg
    img_ref[...] = img.astype(img_ref.dtype)

    # conv3(img) -> sigmoid -> gate -> residual.
    stage_taps(img, gs_scratch)
    gs = gs_scratch[...]                                   # (27, HW)
    y3 = jnp.dot(w3_ref[...].astype(f32), gs, preferred_element_type=f32)
    y3 = y3 + b3_ref[...].astype(f32)
    # sigmoid: exp on the EUP, approximate reciprocal instead of a VALU divide.
    gate = pl.reciprocal(1.0 + jnp.exp(-y3), approx=True)

    x1_ref[...] = (y1 * gate + x).astype(x1_ref.dtype)


@jax.jit
def sam_forward(x, x_img, w1, b1, w2, b2, w3, b3):
    """Equivalent of SAM(n_feat).forward(x, x_img) -> (x1, img), all NCHW."""
    B, C, H, W = x.shape
    HW = H * W

    # Free, layout-preserving reshapes (NCHW row-major == (B, C, H*W) row-major).
    xf = x.reshape(B, C, HW)
    ximgf = x_img.reshape(B, 3, HW)

    # (Cout, Cin, kh, kw) -> (Cout, 9*Cin) with column = (kh*3+kw)*Cin + cin,
    # matching the tap-major stacking done inside the kernel.
    w1t = jnp.transpose(w1, (0, 2, 3, 1)).reshape(C, 9 * C)
    w2t = jnp.transpose(w2, (0, 2, 3, 1)).reshape(3, 9 * C)
    w3t = jnp.transpose(w3, (0, 2, 3, 1)).reshape(C, 9 * 3)
    b1c = b1.reshape(C, 1)
    b2c = b2.reshape(3, 1)
    b3c = b3.reshape(C, 1)

    kernel = functools.partial(_sam_kernel, H=H, W=W)

    batch = lambda b: (b, 0, 0)
    full2 = lambda b: (0, 0)

    x1f, imgf = pl.pallas_call(
        kernel,
        out_shape=(
            jax.ShapeDtypeStruct((B, C, HW), x.dtype),
            jax.ShapeDtypeStruct((B, 3, HW), x.dtype),
        ),
        grid=(B,),
        in_specs=[
            pl.BlockSpec((None, C, HW), batch),   # x       (one batch element)
            pl.BlockSpec((None, 3, HW), batch),   # x_img
            pl.BlockSpec((C, 9 * C), full2),      # conv1 weight (Cout, 9*Cin)
            pl.BlockSpec((C, 1), full2),          # conv1 bias
            pl.BlockSpec((3, 9 * C), full2),      # conv2 weight
            pl.BlockSpec((3, 1), full2),          # conv2 bias
            pl.BlockSpec((C, 9 * 3), full2),      # conv3 weight
            pl.BlockSpec((C, 1), full2),          # conv3 bias
        ],
        out_specs=(
            pl.BlockSpec((None, C, HW), batch),   # x1
            pl.BlockSpec((None, 3, HW), batch),   # img
        ),
        scratch_shapes=[
            pltpu.VMEM((9 * C, HW), jnp.float32),   # staged x taps
            pltpu.VMEM((9 * 3, HW), jnp.float32),   # staged img taps
        ],
        compiler_params=pltpu.CompilerParams(
            dimension_semantics=("parallel",)),
    )(xf, ximgf, w1t, b1c, w2t, b2c, w3t, b3c)

    return x1f.reshape(B, C, H, W), imgf.reshape(B, 3, H, W)


# --------------------------- pure-JAX reference ---------------------------

def _conv2d_ref(x, w, b):
    out = jax.lax.conv_general_dilated(
        x, w, window_strides=(1, 1), padding=((1, 1), (1, 1)),
        dimension_numbers=("NCHW", "OIHW", "NCHW"),
        precision=jax.lax.Precision.HIGHEST)
    return out + b.reshape(1, -1, 1, 1)


def _sam_reference(x, x_img, w1, b1, w2, b2, w3, b3):
    x1 = _conv2d_ref(x, w1, b1)
    img = _conv2d_ref(x, w2, b2) + x_img
    x2 = jax.nn.sigmoid(_conv2d_ref(img, w3, b3))
    return x1 * x2 + x, img


if __name__ == "__main__":
    key = jax.random.PRNGKey(0)
    keys = jax.random.split(key, 8)
    B, C, H, W = 2, 4, 16, 16          # n_feat = 4, 16x16 images

    x = jax.random.normal(keys[0], (B, C, H, W), dtype=jnp.float32)
    x_img = jax.random.normal(keys[1], (B, 3, H, W), dtype=jnp.float32)

    w1 = 0.1 * jax.random.normal(keys[2], (C, C, 3, 3), dtype=jnp.float32)
    b1 = 0.1 * jax.random.normal(keys[3], (C,), dtype=jnp.float32)
    w2 = 0.1 * jax.random.normal(keys[4], (3, C, 3, 3), dtype=jnp.float32)
    b2 = 0.1 * jax.random.normal(keys[5], (3,), dtype=jnp.float32)
    w3 = 0.1 * jax.random.normal(keys[6], (C, 3, 3, 3), dtype=jnp.float32)
    b3 = 0.1 * jax.random.normal(keys[7], (C,), dtype=jnp.float32)

    x1, img = sam_forward(x, x_img, w1, b1, w2, b2, w3, b3)
    x1, img = jax.block_until_ready((x1, img))

    ref_x1, ref_img = _sam_reference(x, x_img, w1, b1, w2, b2, w3, b3)

    assert x1.shape == (B, C, H, W) and img.shape == (B, 3, H, W)
    assert jnp.allclose(img, ref_img, atol=1e-2, rtol=1e-2), "img mismatch vs reference"
    assert jnp.allclose(x1, ref_x1, atol=1e-2, rtol=1e-2), "x1 mismatch vs reference"

    print("KERNEL_OK")
</pallas_src>

<mosaic_0001>
module attributes {stable_mosaic.version = 11 : i64} {
  func.func @_sam_kernel(%arg0: i32, %arg1: memref<1x4x256xf32, #tpu.memory_space<vmem>>, %arg2: memref<1x3x256xf32, #tpu.memory_space<vmem>>, %arg3: memref<4x36xf32, #tpu.memory_space<vmem>>, %arg4: memref<4x1xf32, #tpu.memory_space<vmem>>, %arg5: memref<3x36xf32, #tpu.memory_space<vmem>>, %arg6: memref<3x1xf32, #tpu.memory_space<vmem>>, %arg7: memref<4x27xf32, #tpu.memory_space<vmem>>, %arg8: memref<4x1xf32, #tpu.memory_space<vmem>>, %arg9: memref<1x4x256xf32, #tpu.memory_space<vmem>>, %arg10: memref<1x3x256xf32, #tpu.memory_space<vmem>>, %arg11: memref<36x256xf32, #tpu.memory_space<vmem>>, %arg12: memref<27x256xf32, #tpu.memory_space<vmem>>) attributes {dimension_semantics = [#tpu.dimension_semantics<parallel>], iteration_bounds = array<i64: 2>, scalar_prefetch = 0 : i64, scratch_operands = 2 : i64, tpu.core_type = #tpu.core_type<tc>, window_params = [{transform_indices = @transform_0, window_bounds = array<i64: 1, 4, 256>}, {transform_indices = @transform_1, window_bounds = array<i64: 1, 3, 256>}, {pipeline_mode = #tpu.pipeline_mode<synchronous>, transform_indices = @transform_2, window_bounds = array<i64: 4, 36>}, {pipeline_mode = #tpu.pipeline_mode<synchronous>, transform_indices = @transform_3, window_bounds = array<i64: 4, 1>}, {pipeline_mode = #tpu.pipeline_mode<synchronous>, transform_indices = @transform_4, window_bounds = array<i64: 3, 36>}, {pipeline_mode = #tpu.pipeline_mode<synchronous>, transform_indices = @transform_5, window_bounds = array<i64: 3, 1>}, {pipeline_mode = #tpu.pipeline_mode<synchronous>, transform_indices = @transform_6, window_bounds = array<i64: 4, 27>}, {pipeline_mode = #tpu.pipeline_mode<synchronous>, transform_indices = @transform_7, window_bounds = array<i64: 4, 1>}, {transform_indices = @transform_8, window_bounds = array<i64: 1, 4, 256>}, {transform_indices = @transform_9, window_bounds = array<i64: 1, 3, 256>}]} {
    %c0 = arith.constant 0 : index
    %c0_0 = arith.constant 0 : index
    %c0_1 = arith.constant 0 : index
    %0 = vector.load %arg1[%c0, %c0_0, %c0_1] : memref<1x4x256xf32, #tpu.memory_space<vmem>>, vector<1x4x256xf32>
    %1 = vector.shape_cast %0 : vector<1x4x256xf32> to vector<4x256xf32>
    %c0_2 = arith.constant 0 : index
    %c0_3 = arith.constant 0 : index
    %c0_4 = arith.constant 0 : index
    %2 = vector.load %arg2[%c0_2, %c0_3, %c0_4] : memref<1x3x256xf32, #tpu.memory_space<vmem>>, vector<1x3x256xf32>
    %3 = vector.shape_cast %2 : vector<1x3x256xf32> to vector<3x256xf32>
    %4 = tpu.iota {dimensions = array<i32: 1>} : vector<1x256xi32>
    %c16_i32 = arith.constant 16 : i32
    %c0_i32 = arith.constant 0 : i32
    %5 = arith.cmpi eq, %c16_i32, %c0_i32 : i32
    %c1_i32 = arith.constant 1 : i32
    %6 = arith.select %5, %c1_i32, %c16_i32 : i32
    %7 = vector.broadcast %6 : i32 to vector<1x256xi32>
    %8 = arith.remsi %4, %7 : vector<1x256xi32>
    %c0_i32_5 = arith.constant 0 : i32
    %9 = vector.broadcast %c0_i32_5 : i32 to vector<1x256xi32>
    %10 = arith.cmpi ne, %8, %9 : vector<1x256xi32>
    %c0_i32_6 = arith.constant 0 : i32
    %11 = vector.broadcast %c0_i32_6 : i32 to vector<1x256xi32>
    %12 = arith.cmpi slt, %8, %11 : vector<1x256xi32>
    %c0_i32_7 = arith.constant 0 : i32
    %13 = arith.cmpi slt, %6, %c0_i32_7 : i32
    %14 = vector.broadcast %13 : i1 to vector<1x256xi1>
    %15 = vector.broadcast %14 : vector<1x256xi1> to vector<1x256xi1>
    %16 = arith.xori %12, %15 : vector<1x256xi1>
    %17 = arith.andi %16, %10 : vector<1x256xi1>
    %18 = vector.broadcast %6 : i32 to vector<1x256xi32>
    %19 = arith.addi %8, %18 : vector<1x256xi32>
    %20 = arith.select %17, %19, %8 : vector<1x256xi1>, vector<1x256xi32>
    %c1_i32_8 = arith.constant 1 : i32
    %21 = vector.broadcast %c1_i32_8 : i32 to vector<1x256xi32>
    %22 = arith.cmpi sge, %20, %21 : vector<1x256xi32>
    %c14_i32 = arith.constant 14 : i32
    %23 = vector.broadcast %c14_i32 : i32 to vector<1x256xi32>
    %24 = arith.cmpi sle, %20, %23 : vector<1x256xi32>
    %c16_i32_9 = arith.constant 16 : i32
    %25 = vector.broadcast %c16_i32_9 : i32 to vector<1x256xi32>
    %26 = arith.cmpi sge, %4, %25 : vector<1x256xi32>
    %c240_i32 = arith.constant 240 : i32
    %27 = vector.broadcast %c240_i32 : i32 to vector<1x256xi32>
    %28 = arith.cmpi slt, %4, %27 : vector<1x256xi32>
    %29 = arith.andi %26, %22 : vector<1x256xi1>
    %30 = arith.andi %26, %24 : vector<1x256xi1>
    %31 = arith.andi %28, %22 : vector<1x256xi1>
    %32 = arith.andi %28, %24 : vector<1x256xi1>
    %c17_i32 = arith.constant 17 : i32
    %33 = tpu.dynamic_rotate %1 by %c17_i32 dim 1 : vector<4x256xf32>, i32 -> vector<4x256xf32>
    %cst = arith.constant 0.000000e+00 : f32
    %34 = vector.shape_cast %29 : vector<1x256xi1> to vector<1x256xi1>
    %35 = vector.broadcast %34 : vector<1x256xi1> to vector<4x256xi1>
    %36 = vector.broadcast %cst : f32 to vector<4x256xf32>
    %37 = arith.select %35, %33, %36 : vector<4x256xi1>, vector<4x256xf32>
    %c0_10 = arith.constant 0 : index
    %c0_11 = arith.constant 0 : index
    %38 = vector.load %arg11[%c0_10, %c0_11] : memref<36x256xf32, #tpu.memory_space<vmem>>, vector<4x256xf32>
    tpu.vector_store %arg11[%c0_10, %c0_11], %37 {strides = array<i32>} : memref<36x256xf32, #tpu.memory_space<vmem>>, vector<4x256xf32>,
    %c16_i32_12 = arith.constant 16 : i32
    %39 = tpu.dynamic_rotate %1 by %c16_i32_12 dim 1 : vector<4x256xf32>, i32 -> vector<4x256xf32>
    %cst_13 = arith.constant 0.000000e+00 : f32
    %40 = vector.shape_cast %26 : vector<1x256xi1> to vector<1x256xi1>
    %41 = vector.broadcast %40 : vector<1x256xi1> to vector<4x256xi1>
    %42 = vector.broadcast %cst_13 : f32 to vector<4x256xf32>
    %43 = arith.select %41, %39, %42 : vector<4x256xi1>, vector<4x256xf32>
    %c4 = arith.constant 4 : index
    %c0_14 = arith.constant 0 : index
    %44 = vector.load %arg11[%c4, %c0_14] : memref<36x256xf32, #tpu.memory_space<vmem>>, vector<4x256xf32>
    tpu.vector_store %arg11[%c4, %c0_14], %43 {strides = array<i32>} : memref<36x256xf32, #tpu.memory_space<vmem>>, vector<4x256xf32>,
    %c15_i32 = arith.constant 15 : i32
    %45 = tpu.dynamic_rotate %1 by %c15_i32 dim 1 : vector<4x256xf32>, i32 -> vector<4x256xf32>
    %cst_15 = arith.constant 0.000000e+00 : f32
    %46 = vector.shape_cast %30 : vector<1x256xi1> to vector<1x256xi1>
    %47 = vector.broadcast %46 : vector<1x256xi1> to vector<4x256xi1>
    %48 = vector.broadcast %cst_15 : f32 to vector<4x256xf32>
    %49 = arith.select %47, %45, %48 : vector<4x256xi1>, vector<4x256xf32>
    %c8 = arith.constant 8 : index
    %c0_16 = arith.constant 0 : index
    %50 = vector.load %arg11[%c8, %c0_16] : memref<36x256xf32, #tpu.memory_space<vmem>>, vector<4x256xf32>
    tpu.vector_store %arg11[%c8, %c0_16], %49 {strides = array<i32>} : memref<36x256xf32, #tpu.memory_space<vmem>>, vector<4x256xf32>,
    %c1_i32_17 = arith.constant 1 : i32
    %51 = tpu.dynamic_rotate %1 by %c1_i32_17 dim 1 : vector<4x256xf32>, i32 -> vector<4x256xf32>
    %cst_18 = arith.constant 0.000000e+00 : f32
    %52 = vector.shape_cast %22 : vector<1x256xi1> to vector<1x256xi1>
    %53 = vector.broadcast %52 : vector<1x256xi1> to vector<4x256xi1>
    %54 = vector.broadcast %cst_18 : f32 to vector<4x256xf32>
    %55 = arith.select %53, %51, %54 : vector<4x256xi1>, vector<4x256xf32>
    %c12 = arith.constant 12 : index
    %c0_19 = arith.constant 0 : index
    %56 = vector.load %arg11[%c12, %c0_19] : memref<36x256xf32, #tpu.memory_space<vmem>>, vector<4x256xf32>
    tpu.vector_store %arg11[%c12, %c0_19], %55 {strides = array<i32>} : memref<36x256xf32, #tpu.memory_space<vmem>>, vector<4x256xf32>,
    %c16 = arith.constant 16 : index
    %c0_20 = arith.constant 0 : index
    %57 = vector.load %arg11[%c16, %c0_20] : memref<36x256xf32, #tpu.memory_space<vmem>>, vector<4x256xf32>
    tpu.vector_store %arg11[%c16, %c0_20], %1 {strides = array<i32>} : memref<36x256xf32, #tpu.memory_space<vmem>>, vector<4x256xf32>,
    %c255_i32 = arith.constant 255 : i32
    %58 = tpu.dynamic_rotate %1 by %c255_i32 dim 1 : vector<4x256xf32>, i32 -> vector<4x256xf32>
    %cst_21 = arith.constant 0.000000e+00 : f32
    %59 = vector.shape_cast %24 : vector<1x256xi1> to vector<1x256xi1>
    %60 = vector.broadcast %59 : vector<1x256xi1> to vector<4x256xi1>
    %61 = vector.broadcast %cst_21 : f32 to vector<4x256xf32>
    %62 = arith.select %60, %58, %61 : vector<4x256xi1>, vector<4x256xf32>
    %c20 = arith.constant 20 : index
    %c0_22 = arith.constant 0 : index
    %63 = vector.load %arg11[%c20, %c0_22] : memref<36x256xf32, #tpu.memory_space<vmem>>, vector<4x256xf32>
    tpu.vector_store %arg11[%c20, %c0_22], %62 {strides = array<i32>} : memref<36x256xf32, #tpu.memory_space<vmem>>, vector<4x256xf32>,
    %c241_i32 = arith.constant 241 : i32
    %64 = tpu.dynamic_rotate %1 by %c241_i32 dim 1 : vector<4x256xf32>, i32 -> vector<4x256xf32>
    %cst_23 = arith.constant 0.000000e+00 : f32
    %65 = vector.shape_cast %31 : vector<1x256xi1> to vector<1x256xi1>
    %66 = vector.broadcast %65 : vector<1x256xi1> to vector<4x256xi1>
    %67 = vector.broadcast %cst_23 : f32 to vector<4x256xf32>
    %68 = arith.select %66, %64, %67 : vector<4x256xi1>, vector<4x256xf32>
    %c24 = arith.constant 24 : index
    %c0_24 = arith.constant 0 : index
    %69 = vector.load %arg11[%c24, %c0_24] : memref<36x256xf32, #tpu.memory_space<vmem>>, vector<4x256xf32>
    tpu.vector_store %arg11[%c24, %c0_24], %68 {strides = array<i32>} : memref<36x256xf32, #tpu.memory_space<vmem>>, vector<4x256xf32>,
    %c240_i32_25 = arith.constant 240 : i32
    %70 = tpu.dynamic_rotate %1 by %c240_i32_25 dim 1 : vector<4x256xf32>, i32 -> vector<4x256xf32>
    %cst_26 = arith.constant 0.000000e+00 : f32
    %71 = vector.shape_cast %28 : vector<1x256xi1> to vector<1x256xi1>
    %72 = vector.broadcast %71 : vector<1x256xi1> to vector<4x256xi1>
    %73 = vector.broadcast %cst_26 : f32 to vector<4x256xf32>
    %74 = arith.select %72, %70, %73 : vector<4x256xi1>, vector<4x256xf32>
    %c28 = arith.constant 28 : index
    %c0_27 = arith.constant 0 : index
    %75 = vector.load %arg11[%c28, %c0_27] : memref<36x256xf32, #tpu.memory_space<vmem>>, vector<4x256xf32>
    tpu.vector_store %arg11[%c28, %c0_27], %74 {strides = array<i32>} : memref<36x256xf32, #tpu.memory_space<vmem>>, vector<4x256xf32>,
    %c239_i32 = arith.constant 239 : i32
    %76 = tpu.dynamic_rotate %1 by %c239_i32 dim 1 : vector<4x256xf32>, i32 -> vector<4x256xf32>
    %cst_28 = arith.constant 0.000000e+00 : f32
    %77 = vector.shape_cast %32 : vector<1x256xi1> to vector<1x256xi1>
    %78 = vector.broadcast %77 : vector<1x256xi1> to vector<4x256xi1>
    %79 = vector.broadcast %cst_28 : f32 to vector<4x256xf32>
    %80 = arith.select %78, %76, %79 : vector<4x256xi1>, vector<4x256xf32>
    %c32 = arith.constant 32 : index
    %c0_29 = arith.constant 0 : index
    %81 = vector.load %arg11[%c32, %c0_29] : memref<36x256xf32, #tpu.memory_space<vmem>>, vector<4x256xf32>
    tpu.vector_store %arg11[%c32, %c0_29], %80 {strides = array<i32>} : memref<36x256xf32, #tpu.memory_space<vmem>>, vector<4x256xf32>,
    %c0_30 = arith.constant 0 : index
    %c0_31 = arith.constant 0 : index
    %82 = vector.load %arg11[%c0_30, %c0_31] : memref<36x256xf32, #tpu.memory_space<vmem>>, vector<36x256xf32>
    %c0_32 = arith.constant 0 : index
    %c0_33 = arith.constant 0 : index
    %83 = vector.load %arg3[%c0_32, %c0_33] : memref<4x36xf32, #tpu.memory_space<vmem>>, vector<4x36xf32>
    %cst_34 = arith.constant dense<0.000000e+00> : vector<4x256xf32>
    %84 = tpu.matmul %83, %82, %cst_34 {dimension_numbers = #tpu.dot_dimension_numbers<[1], [0], [0], [1], [0, 0, 1, 1], [], []>} : vector<4x36xf32>, vector<36x256xf32>, vector<4x256xf32> -> vector<4x256xf32>
    %c0_35 = arith.constant 0 : index
    %c0_36 = arith.constant 0 : index
    %85 = vector.load %arg4[%c0_35, %c0_36] : memref<4x1xf32, #tpu.memory_space<vmem>>, vector<4x1xf32>
    %86 = vector.broadcast %85 : vector<4x1xf32> to vector<4x256xf32>
    %87 = arith.addf %84, %86 : vector<4x256xf32>
    %c0_37 = arith.constant 0 : index
    %c0_38 = arith.constant 0 : index
    %88 = vector.load %arg5[%c0_37, %c0_38] : memref<3x36xf32, #tpu.memory_space<vmem>>, vector<3x36xf32>
    %cst_39 = arith.constant dense<0.000000e+00> : vector<3x256xf32>
    %89 = tpu.matmul %88, %82, %cst_39 {dimension_numbers = #tpu.dot_dimension_numbers<[1], [0], [0], [1], [0, 0, 1, 1], [], []>} : vector<3x36xf32>, vector<36x256xf32>, vector<3x256xf32> -> vector<3x256xf32>
    %c0_40 = arith.constant 0 : index
    %c0_41 = arith.constant 0 : index
    %90 = vector.load %arg6[%c0_40, %c0_41] : memref<3x1xf32, #tpu.memory_space<vmem>>, vector<3x1xf32>
    %91 = vector.broadcast %90 : vector<3x1xf32> to vector<3x256xf32>
    %92 = arith.addf %89, %91 : vector<3x256xf32>
    %93 = arith.addf %92, %3 : vector<3x256xf32>
    %c0_42 = arith.constant 0 : index
    %c0_43 = arith.constant 0 : index
    %c0_44 = arith.constant 0 : index
    %94 = vector.load %arg10[%c0_42, %c0_43, %c0_44] : memref<1x3x256xf32, #tpu.memory_space<vmem>>, vector<1x3x256xf32>
    %95 = vector.shape_cast %94 : vector<1x3x256xf32> to vector<3x256xf32>
    %96 = vector.shape_cast %93 : vector<3x256xf32> to vector<1x3x256xf32>
    tpu.vector_store %arg10[%c0_42, %c0_43, %c0_44], %96 {strides = array<i32>} : memref<1x3x256xf32, #tpu.memory_space<vmem>>, vector<1x3x256xf32>,
    %c17_i32_45 = arith.constant 17 : i32
    %97 = tpu.dynamic_rotate %93 by %c17_i32_45 dim 1 : vector<3x256xf32>, i32 -> vector<3x256xf32>
    %cst_46 = arith.constant 0.000000e+00 : f32
    %98 = vector.shape_cast %29 : vector<1x256xi1> to vector<1x256xi1>
    %99 = vector.broadcast %98 : vector<1x256xi1> to vector<3x256xi1>
    %100 = vector.broadcast %cst_46 : f32 to vector<3x256xf32>
    %101 = arith.select %99, %97, %100 : vector<3x256xi1>, vector<3x256xf32>
    %c0_47 = arith.constant 0 : index
    %c0_48 = arith.constant 0 : index
    %102 = vector.load %arg12[%c0_47, %c0_48] : memref<27x256xf32, #tpu.memory_space<vmem>>, vector<3x256xf32>
    tpu.vector_store %arg12[%c0_47, %c0_48], %101 {strides = array<i32>} : memref<27x256xf32, #tpu.memory_space<vmem>>, vector<3x256xf32>,
    %c16_i32_49 = arith.constant 16 : i32
    %103 = tpu.dynamic_rotate %93 by %c16_i32_49 dim 1 : vector<3x256xf32>, i32 -> vector<3x256xf32>
    %cst_50 = arith.constant 0.000000e+00 : f32
    %104 = vector.shape_cast %26 : vector<1x256xi1> to vector<1x256xi1>
    %105 = vector.broadcast %104 : vector<1x256xi1> to vector<3x256xi1>
    %106 = vector.broadcast %cst_50 : f32 to vector<3x256xf32>
    %107 = arith.select %105, %103, %106 : vector<3x256xi1>, vector<3x256xf32>
    %c3 = arith.constant 3 : index
    %c0_51 = arith.constant 0 : index
    %108 = vector.load %arg12[%c3, %c0_51] : memref<27x256xf32, #tpu.memory_space<vmem>>, vector<3x256xf32>
    tpu.vector_store %arg12[%c3, %c0_51], %107 {strides = array<i32>} : memref<27x256xf32, #tpu.memory_space<vmem>>, vector<3x256xf32>,
    %c15_i32_52 = arith.constant 15 : i32
    %109 = tpu.dynamic_rotate %93 by %c15_i32_52 dim 1 : vector<3x256xf32>, i32 -> vector<3x256xf32>
    %cst_53 = arith.constant 0.000000e+00 : f32
    %110 = vector.shape_cast %30 : vector<1x256xi1> to vector<1x256xi1>
    %111 = vector.broadcast %110 : vector<1x256xi1> to vector<3x256xi1>
    %112 = vector.broadcast %cst_53 : f32 to vector<3x256xf32>
    %113 = arith.select %111, %109, %112 : vector<3x256xi1>, vector<3x256xf32>
    %c6 = arith.constant 6 : index
    %c0_54 = arith.constant 0 : index
    %114 = vector.load %arg12[%c6, %c0_54] : memref<27x256xf32, #tpu.memory_space<vmem>>, vector<3x256xf32>
    tpu.vector_store %arg12[%c6, %c0_54], %113 {strides = array<i32>} : memref<27x256xf32, #tpu.memory_space<vmem>>, vector<3x256xf32>,
    %c1_i32_55 = arith.constant 1 : i32
    %115 = tpu.dynamic_rotate %93 by %c1_i32_55 dim 1 : vector<3x256xf32>, i32 -> vector<3x256xf32>
    %cst_56 = arith.constant 0.000000e+00 : f32
    %116 = vector.shape_cast %22 : vector<1x256xi1> to vector<1x256xi1>
    %117 = vector.broadcast %116 : vector<1x256xi1> to vector<3x256xi1>
    %118 = vector.broadcast %cst_56 : f32 to vector<3x256xf32>
    %119 = arith.select %117, %115, %118 : vector<3x256xi1>, vector<3x256xf32>
    %c9 = arith.constant 9 : index
    %c0_57 = arith.constant 0 : index
    %120 = vector.load %arg12[%c9, %c0_57] : memref<27x256xf32, #tpu.memory_space<vmem>>, vector<3x256xf32>
    tpu.vector_store %arg12[%c9, %c0_57], %119 {strides = array<i32>} : memref<27x256xf32, #tpu.memory_space<vmem>>, vector<3x256xf32>,
    %c12_58 = arith.constant 12 : index
    %c0_59 = arith.constant 0 : index
    %121 = vector.load %arg12[%c12_58, %c0_59] : memref<27x256xf32, #tpu.memory_space<vmem>>, vector<3x256xf32>
    tpu.vector_store %arg12[%c12_58, %c0_59], %93 {strides = array<i32>} : memref<27x256xf32, #tpu.memory_space<vmem>>, vector<3x256xf32>,
    %c255_i32_60 = arith.constant 255 : i32
    %122 = tpu.dynamic_rotate %93 by %c255_i32_60 dim 1 : vector<3x256xf32>, i32 -> vector<3x256xf32>
    %cst_61 = arith.constant 0.000000e+00 : f32
    %123 = vector.shape_cast %24 : vector<1x256xi1> to vector<1x256xi1>
    %124 = vector.broadcast %123 : vector<1x256xi1> to vector<3x256xi1>
    %125 = vector.broadcast %cst_61 : f32 to vector<3x256xf32>
    %126 = arith.select %124, %122, %125 : vector<3x256xi1>, vector<3x256xf32>
    %c15 = arith.constant 15 : index
    %c0_62 = arith.constant 0 : index
    %127 = vector.load %arg12[%c15, %c0_62] : memref<27x256xf32, #tpu.memory_space<vmem>>, vector<3x256xf32>
    tpu.vector_store %arg12[%c15, %c0_62], %126 {strides = array<i32>} : memref<27x256xf32, #tpu.memory_space<vmem>>, vector<3x256xf32>,
    %c241_i32_63 = arith.constant 241 : i32
    %128 = tpu.dynamic_rotate %93 by %c241_i32_63 dim 1 : vector<3x256xf32>, i32 -> vector<3x256xf32>
    %cst_64 = arith.constant 0.000000e+00 : f32
    %129 = vector.shape_cast %31 : vector<1x256xi1> to vector<1x256xi1>
    %130 = vector.broadcast %129 : vector<1x256xi1> to vector<3x256xi1>
    %131 = vector.broadcast %cst_64 : f32 to vector<3x256xf32>
    %132 = arith.select %130, %128, %131 : vector<3x256xi1>, vector<3x256xf32>
    %c18 = arith.constant 18 : index
    %c0_65 = arith.constant 0 : index
    %133 = vector.load %arg12[%c18, %c0_65] : memref<27x256xf32, #tpu.memory_space<vmem>>, vector<3x256xf32>
    tpu.vector_store %arg12[%c18, %c0_65], %132 {strides = array<i32>} : memref<27x256xf32, #tpu.memory_space<vmem>>, vector<3x256xf32>,
    %c240_i32_66 = arith.constant 240 : i32
    %134 = tpu.dynamic_rotate %93 by %c240_i32_66 dim 1 : vector<3x256xf32>, i32 -> vector<3x256xf32>
    %cst_67 = arith.constant 0.000000e+00 : f32
    %135 = vector.shape_cast %28 : vector<1x256xi1> to vector<1x256xi1>
    %136 = vector.broadcast %135 : vector<1x256xi1> to vector<3x256xi1>
    %137 = vector.broadcast %cst_67 : f32 to vector<3x256xf32>
    %138 = arith.select %136, %134, %137 : vector<3x256xi1>, vector<3x256xf32>
    %c21 = arith.constant 21 : index
    %c0_68 = arith.constant 0 : index
    %139 = vector.load %arg12[%c21, %c0_68] : memref<27x256xf32, #tpu.memory_space<vmem>>, vector<3x256xf32>
    tpu.vector_store %arg12[%c21, %c0_68], %138 {strides = array<i32>} : memref<27x256xf32, #tpu.memory_space<vmem>>, vector<3x256xf32>,
    %c239_i32_69 = arith.constant 239 : i32
    %140 = tpu.dynamic_rotate %93 by %c239_i32_69 dim 1 : vector<3x256xf32>, i32 -> vector<3x256xf32>
    %cst_70 = arith.constant 0.000000e+00 : f32
    %141 = vector.shape_cast %32 : vector<1x256xi1> to vector<1x256xi1>
    %142 = vector.broadcast %141 : vector<1x256xi1> to vector<3x256xi1>
    %143 = vector.broadcast %cst_70 : f32 to vector<3x256xf32>
    %144 = arith.select %142, %140, %143 : vector<3x256xi1>, vector<3x256xf32>
    %c24_71 = arith.constant 24 : index
    %c0_72 = arith.constant 0 : index
    %145 = vector.load %arg12[%c24_71, %c0_72] : memref<27x256xf32, #tpu.memory_space<vmem>>, vector<3x256xf32>
    tpu.vector_store %arg12[%c24_71, %c0_72], %144 {strides = array<i32>} : memref<27x256xf32, #tpu.memory_space<vmem>>, vector<3x256xf32>,
    %c0_73 = arith.constant 0 : index
    %c0_74 = arith.constant 0 : index
    %146 = vector.load %arg12[%c0_73, %c0_74] : memref<27x256xf32, #tpu.memory_space<vmem>>, vector<27x256xf32>
    %c0_75 = arith.constant 0 : index
    %c0_76 = arith.constant 0 : index
    %147 = vector.load %arg7[%c0_75, %c0_76] : memref<4x27xf32, #tpu.memory_space<vmem>>, vector<4x27xf32>
    %cst_77 = arith.constant dense<0.000000e+00> : vector<4x256xf32>
    %148 = tpu.matmul %147, %146, %cst_77 {dimension_numbers = #tpu.dot_dimension_numbers<[1], [0], [0], [1], [0, 0, 1, 1], [], []>} : vector<4x27xf32>, vector<27x256xf32>, vector<4x256xf32> -> vector<4x256xf32>
    %c0_78 = arith.constant 0 : index
    %c0_79 = arith.constant 0 : index
    %149 = vector.load %arg8[%c0_78, %c0_79] : memref<4x1xf32, #tpu.memory_space<vmem>>, vector<4x1xf32>
    %150 = vector.broadcast %149 : vector<4x1xf32> to vector<4x256xf32>
    %151 = arith.addf %148, %150 : vector<4x256xf32>
    %cst_80 = arith.constant 0.000000e+00 : f32
    %152 = vector.broadcast %cst_80 : f32 to vector<4x256xf32>
    %153 = arith.subf %152, %151 : vector<4x256xf32>
    %154 = math.exp %153 : vector<4x256xf32>
    %cst_81 = arith.constant 1.000000e+00 : f32
    %155 = vector.broadcast %cst_81 : f32 to vector<4x256xf32>
    %156 = arith.addf %155, %154 : vector<4x256xf32>
    %157 = tpu.reciprocal %156 {approx = true} : vector<4x256xf32> -> vector<4x256xf32>
    %158 = arith.mulf %87, %157 : vector<4x256xf32>
    %159 = arith.addf %158, %1 : vector<4x256xf32>
    %c0_82 = arith.constant 0 : index
    %c0_83 = arith.constant 0 : index
    %c0_84 = arith.constant 0 : index
    %160 = vector.load %arg9[%c0_82, %c0_83, %c0_84] : memref<1x4x256xf32, #tpu.memory_space<vmem>>, vector<1x4x256xf32>
    %161 = vector.shape_cast %160 : vector<1x4x256xf32> to vector<4x256xf32>
    %162 = vector.shape_cast %159 : vector<4x256xf32> to vector<1x4x256xf32>
    tpu.vector_store %arg9[%c0_82, %c0_83, %c0_84], %162 {strides = array<i32>} : memref<1x4x256xf32, #tpu.memory_space<vmem>>, vector<1x4x256xf32>,
    return
  }
  func.func @transform_0(%arg0: i32) -> (i32, i32, i32) {
    %c0_i32 = arith.constant 0 : i32
    %c0_i32_0 = arith.constant 0 : i32
    %c0_i32_1 = arith.constant 0 : i32
    return %arg0, %c0_i32, %c0_i32_0 : i32, i32, i32
  }
  func.func @transform_1(%arg0: i32) -> (i32, i32, i32) {
    %c0_i32 = arith.constant 0 : i32
    %c0_i32_0 = arith.constant 0 : i32
    %c0_i32_1 = arith.constant 0 : i32
    return %arg0, %c0_i32, %c0_i32_0 : i32, i32, i32
  }
  func.func @transform_2(%arg0: i32) -> (i32, i32) {
    %c0_i32 = arith.constant 0 : i32
    %c0_i32_0 = arith.constant 0 : i32
    %c0_i32_1 = arith.constant 0 : i32
    return %c0_i32, %c0_i32_0 : i32, i32
  }
  func.func @transform_3(%arg0: i32) -> (i32, i32) {
    %c0_i32 = arith.constant 0 : i32
    %c0_i32_0 = arith.constant 0 : i32
    %c0_i32_1 = arith.constant 0 : i32
    return %c0_i32, %c0_i32_0 : i32, i32
  }
  func.func @transform_4(%arg0: i32) -> (i32, i32) {
    %c0_i32 = arith.constant 0 : i32
    %c0_i32_0 = arith.constant 0 : i32
    %c0_i32_1 = arith.constant 0 : i32
    return %c0_i32, %c0_i32_0 : i32, i32
  }
  func.func @transform_5(%arg0: i32) -> (i32, i32) {
    %c0_i32 = arith.constant 0 : i32
    %c0_i32_0 = arith.constant 0 : i32
    %c0_i32_1 = arith.constant 0 : i32
    return %c0_i32, %c0_i32_0 : i32, i32
  }
  func.func @transform_6(%arg0: i32) -> (i32, i32) {
    %c0_i32 = arith.constant 0 : i32
    %c0_i32_0 = arith.constant 0 : i32
    %c0_i32_1 = arith.constant 0 : i32
    return %c0_i32, %c0_i32_0 : i32, i32
  }
  func.func @transform_7(%arg0: i32) -> (i32, i32) {
    %c0_i32 = arith.constant 0 : i32
    %c0_i32_0 = arith.constant 0 : i32
    %c0_i32_1 = arith.constant 0 : i32
    return %c0_i32, %c0_i32_0 : i32, i32
  }
  func.func @transform_8(%arg0: i32) -> (i32, i32, i32) {
    %c0_i32 = arith.constant 0 : i32
    %c0_i32_0 = arith.constant 0 : i32
    %c0_i32_1 = arith.constant 0 : i32
    return %arg0, %c0_i32, %c0_i32_0 : i32, i32, i32
  }
  func.func @transform_9(%arg0: i32) -> (i32, i32, i32) {
    %c0_i32 = arith.constant 0 : i32
    %c0_i32_0 = arith.constant 0 : i32
    %c0_i32_1 = arith.constant 0 : i32
    return %arg0, %c0_i32, %c0_i32_0 : i32, i32, i32
  }
}

</mosaic_0001>

<bundles_post_ra>
// kernel: sam_forward.1
= control target key start
LH: loop header
LB: loop body
LE: loop exit
PB: predicated region body
PF: predicated region fallthrough
CT: control target
= control target key end

     0   :  { %s1246_s30 = smov 0   ;;  %s1541_s0 = inlined_call_operand.vmem [shape: f32[2,4,256], index: 0, kind: input, shape index: {}]   ;;  %s1542_s1 = inlined_call_operand.vmem [shape: f32[2,3,256], index: 1, kind: input, shape index: {}]   ;;  %s1543_s2 = inlined_call_operand.vmem [shape: f32[4,36], index: 2, kind: input, shape index: {}]   ;;  %s1544_s3 = inlined_call_operand.vmem [shape: f32[4,1], index: 3, kind: input, shape index: {}]   ;;  %s1545_s4 = inlined_call_operand.vmem [shape: f32[3,36], index: 4, kind: input, shape index: {}]   ;;  %s1546_s5 = inlined_call_operand.vmem [shape: f32[3,1], index: 5, kind: input, shape index: {}]   ;;  %s1547_s6 = inlined_call_operand.vmem [shape: f32[4,27], index: 6, kind: input, shape index: {}]   ;;  %s1548_s7 = inlined_call_operand.vmem [shape: f32[4,1], index: 7, kind: input, shape index: {}]   ;;  %s1549_s8 = inlined_call_operand.vmem [shape: f32[2,4,256], index: 8, kind: output, shape index: {0}]   ;;  %s1550_s9 = inlined_call_operand.vmem [shape: f32[2,3,256], index: 9, kind: output, shape index: {1}]  }
   0x1 LB: > { %s1092_s10 = sadd.s32 4294967295, %s1183_s30   ;;  %p1096_p0 = scmp.ge.s32.totalorder %s1183_s30, 1  ;;  %s1183_s30 = sphi %s1246_s30, %s20_s30  }
   0x2   : > { %p300_p1 = scmp.lt.s32.totalorder %s1183_s30, 3 }
   0x4   : > { %p301_p2 = pnand %p1096_p0, %p300_p1 }
   0x5   : > { %p346_p3 = scmp.lt.s32.totalorder (!%p301_p2), %s1092_s10, 1  ;;  %s1185_s15 = smov (!%p301_p2), 16   ;;  %v1193_v2 = vmov (!%p301_p2), 0.0   ;;  %v660_v3 = vld [vmem:[%s1546_s5] sm:$0x7] (!%p301_p2)  ;;  %v1194_v4 = vmov (!%p301_p2), 0   ;;  %v368_v5 = vlaneseq (!%p301_p2) }
   0x6   : > { %304 = sbr.rel (%p301_p2) target bundleno = 803 (0x323), region = 52  ;;  %s1186_s16 = smov (!%p301_p2), 1   ;;  %733 = vmatprep.mubr.f32.mxu1 (!%p301_p2), %v1193_v2  ;;  %652 = vmatprep.mubr.f32.mxu0 (!%p301_p2), %v1193_v2  ;;  %v884_v24 = vld [vmem:[%s1547_s6] sm:$0xf] (!%p301_p2) }
   0x7   : > { %s1187_s17 = smov (!%p301_p2), 17   ;;  %s1188_s18 = smov (!%p301_p2), 15   ;;  %1165 = vset.pattern.permute.xlu0 (!%p301_p2), %v1194_v4  ;;  %1166 = vset.pattern.permute.xlu1 (!%p301_p2), %v1194_v4  ;;  %v1305_v6 = vand.u32 (!%p301_p2), 127, %v368_v5 }
   0x8   : > { %s1189_s19 = smov (!%p301_p2), 127   ;;  %s1190_s20 = smov (!%p301_p2), 112  }
   0x9   : > { %s1191_s21 = smov (!%p301_p2), 113   ;;  %s1192_s22 = smov (!%p301_p2), 111   ;;  %v1308_v7 = vadd.s32 (!%p301_p2), 128, %v1305_v6  ;;  %v375_v10 = vand.u32 (!%p301_p2), 15, %v1305_v6  ;;  %vm433_vm0 = vcmp.lt.s32.totalorder (!%p301_p2), %v1305_v6, 16  ;;  %vm399_vm1 = vcmp.ge.s32.totalorder (!%p301_p2), %v1305_v6, 16 }
   0xa   : > { %vm1552_vm3 = vcmp.lt.s32.totalorder (!%p301_p2), %v1305_v6, 17  ;;  %vm469_vm4 = vcmp.lt.s32.totalorder (!%p301_p2), %v1305_v6, 1  ;;  %vm454_vm8 = vcmp.lt.s32.totalorder (!%p301_p2), %v1305_v6, 15  ;;  %vm492_vm11 = vcmp.lt.s32.totalorder (!%p301_p2), %v1305_v6, 127 }
   0xb   : > { %v382_v11 = vand.u32 (!%p301_p2), 15, %v1308_v7  ;;  %vm1314_vm2 = vcmp.ge.s32.totalorder (!%p301_p2), %v375_v10, 1  ;;  %vm1338_vm7 = vcmp.le.s32.totalorder (!%p301_p2), %v375_v10, 14  ;;  %vm1551_vm12 = vcmp.lt.s32.totalorder (!%p301_p2), %v1305_v6, 112 }
   0xc   : > { %vm1334_vm6 = vmand (!%p301_p2), %vm399_vm1, %vm1314_vm2  ;;  %vm1553_vm13 = vcmp.lt.s32.totalorder (!%p301_p2), %v1308_v7, 240  ;;  %vm513_vm14 = vcmp.lt.s32.totalorder (!%p301_p2), %v1305_v6, 113 }
   0xd   : > { %s1579_s10 = smov (!%p346_p3, %s1092_s10), 1  ;;  %vm1326_vm5 = vcmp.ge.s32.totalorder %v382_v11, 1  ;;  %vm1359_vm9 = vcmp.le.s32.totalorder %v382_v11, 14  ;;  %vm1367_vm10 = vmand %vm399_vm1, %vm1338_vm7 }
   0xe   : > { %s1254_s11 = sshll.u32 %s1579_s10, 3  ;;  %vm1401_vm15 = vmand %vm1553_vm13, %vm1326_vm5 }
   0xf   : > { %s350_s14 = scalar_lea.vmem %s1541_s0, %s1254_s11  ;;  %s355_s29 = scalar_lea.vmem %s1542_s1, %s1254_s11 }
  0x10   : > { %v1260_v0 = vld [vmem:[%s350_s14] sm:$0xff]  ;;  %s365_s13 = scalar_lea.vmem %s1550_s9, %s1254_s11  ;;  %s360_s24 = scalar_lea.vmem %s1549_s8, %s1254_s11 }
  0x11   : > { %429 = vrot.lane.b32.xlu1 %v1260_v0, %s1185_s15  ;;  %486 = vst [vmem:[#allocation2 + $0x20] sm:$0xf] %v1260_v0  ;;  %465 = vrot.lane.b32.xlu0 %v1260_v0, %s1186_s16  ;;  %v1269_v1 = vcombine.high %v1260_v0, %v1260_v0 }
  0x13   : > { %487 = vst [vmem:[#allocation2 + $0x28] sm:$0xf] %v1269_v1 }
  0x15   : > { %414 = vrot.lane.b32.xlu0 %v1260_v0, %s1187_s17  ;;  %431 = vrot.lane.b32.xlu1 %v1269_v1, %s1185_s15 }
  0x19   : > { %416 = vrot.lane.b32.xlu1 %v1269_v1, %s1187_s17  ;;  %467 = vrot.lane.b32.xlu0 %v1269_v1, %s1186_s16 }
  0x1d   : > { %452 = vrot.lane.b32.xlu1 %v1269_v1, %s1188_s18  ;;  %450 = vrot.lane.b32.xlu0 %v1260_v0, %s1188_s18 }
  0x21   : > { %490 = vrot.lane.b32.xlu1 %v1269_v1, %s1189_s19  ;;  %488 = vrot.lane.b32.xlu0 %v1260_v0, %s1189_s19 }
  0x25   : > { %526 = vrot.lane.b32.xlu1 %v1269_v1, %s1190_s20  ;;  %524 = vrot.lane.b32.xlu0 %v1260_v0, %s1190_s20 }
  0x29   : > { %511 = vrot.lane.b32.xlu1 %v1269_v1, %s1191_s21  ;;  %509 = vrot.lane.b32.xlu0 %v1260_v0, %s1191_s21 }
  0x2d   : > { %547 = vrot.lane.b32.xlu1 %v1269_v1, %s1192_s22  ;;  %545 = vrot.lane.b32.xlu0 %v1260_v0, %s1192_s22 }
  0x31   : > { %663 = vperm.xlu0 %1165, %v660_v3  }
  0x83   : > { %v430_v8 = vpop.permute.xlu1 %429  ;;  %v466_v9 = vpop.permute.xlu0 %465 }
  0x87   : > { %v415_v12 = vpop.permute.xlu0 %414  ;;  %v432_v13 = vpop.permute.xlu1 %431 }
  0x88   : > { %v434_v15 = vsel %vm433_vm0, %v430_v8, %v432_v13  ;;  %v435_v16 = vsel %vm433_vm0, %v432_v13, %v430_v8 }
  0x89   : > { %v440_v17 = vsel %vm399_vm1, %v435_v16, 0.0  ;;  %v445_v18 = vrot.slane %v434_v15, 4 }
  0x8a   : > { %v444_v19 = vrot.slane %v440_v17, 4 }
  0x8b   : > { %449 = vst [vmem:[#allocation2 + $0x8] sm:$0xf0] %v445_v18  ;;  %v417_v22 = vpop.permute.xlu1 %416  ;;  %v468_v23 = vpop.permute.xlu0 %467 }
  0x8c   : > { %448 = vst [vmem:[#allocation2] sm:$0xf0] %v444_v19  ;;  %v419_v25 = vsel %vm1552_vm3, %v415_v12, %v417_v22  ;;  %v420_v26 = vsel %vm1552_vm3, %v417_v22, %v415_v12  ;;  %v470_v27 = vsel %vm469_vm4, %v466_v9, %v468_v23  ;;  %v471_v28 = vsel %vm469_vm4, %v468_v23, %v466_v9  ;;  %vm1418_vm3 = vmand %vm1553_vm13, %vm1359_vm9 }
  0x8d   : > { %v425_v29 = vsel %vm1334_vm6, %v420_v26, 0.0  ;;  %v426_v30 = vsel %vm1326_vm5, %v419_v25, 0.0  ;;  %v476_v31 = vsel %vm1314_vm2, %v471_v28, 0.0  ;;  %v477_v32 = vsel %vm1326_vm5, %v470_v27, 0.0 }
  0x8e   : > { %427 = vst [vmem:[#allocation2] sm:$0xf] %v425_v29  ;;  %428 = vst [vmem:[#allocation2 + $0x8] sm:$0xf] %v426_v30  ;;  %v480_v33 = vrot.slane %v476_v31, 4  ;;  %v481_v34 = vrot.slane %v477_v32, 4 }
  0x8f   : > { %v453_v37 = vpop.permute.xlu1 %452  ;;  %v451_v38 = vpop.permute.xlu0 %450  ;;  %v659_v31 = vld [vmem:[%s1545_s4] sm:$0x7] }
  0x90   : > { %484 = vst [vmem:[#allocation2 + $0x10] sm:$0xf0] %v480_v33  ;;  %485 = vst [vmem:[#allocation2 + $0x18] sm:$0xf0] %v481_v34  ;;  %v455_v39 = vsel %vm454_vm8, %v451_v38, %v453_v37  ;;  %v456_v40 = vsel %vm454_vm8, %v453_v37, %v451_v38  ;;  %v367_v32 = vld [vmem:[%s355_s29] sm:$0x77] }
  0x91   : > { %v461_v41 = vsel %vm1367_vm10, %v456_v40, 0.0  ;;  %v462_v42 = vsel %vm1359_vm9, %v455_v39, 0.0  ;;  %v741_v37 = vcombine.high %v367_v32, %v367_v32 }
  0x92   : > { %463 = vst [vmem:[#allocation2 + $0x10] sm:$0xf] %v461_v41  ;;  %464 = vst [vmem:[#allocation2 + $0x18] sm:$0xf] %v462_v42 }
  0x93   : > { %v491_v43 = vpop.permute.xlu1 %490  ;;  %v489_v44 = vpop.permute.xlu0 %488 }
  0x94   : > { %v493_v45 = vsel %vm492_vm11, %v489_v44, %v491_v43  ;;  %v494_v46 = vsel %vm492_vm11, %v491_v43, %v489_v44 }
  0x95   : > { %v499_v47 = vsel %vm1338_vm7, %v493_v45, 0.0  ;;  %v500_v48 = vsel %vm1359_vm9, %v494_v46, 0.0  ;;  %v561_v55 = vld [vmem:[#allocation2 + $0x8] sm:$0xff]  ;;  %v560_v59 = vld [vmem:[#allocation2] sm:$0xff] }
  0x96   : > { %v503_v49 = vrot.slane %v499_v47, 4  ;;  %v504_v50 = vrot.slane %v500_v48, 4  ;;  %v570_v46 = vld [vmem:[%s1543_s2] sm:$0xf] }
  0x97   : > { %v527_v51 = vpop.permute.xlu1 %526  ;;  %v525_v52 = vpop.permute.xlu0 %524  ;;  %v885_v47 = vld [vmem:[%s1548_s7] sm:$0xf] }
  0x98   : > { %507 = vst [vmem:[#allocation2 + $0x20] sm:$0xf0] %v503_v49  ;;  %508 = vst [vmem:[#allocation2 + $0x28] sm:$0xf0] %v504_v50  ;;  %v529_v53 = vsel %vm1551_vm12, %v525_v52, %v527_v51  ;;  %v530_v54 = vsel %vm1551_vm12, %v527_v51, %v525_v52  ;;  %vm1554_vm12 = vcmp.lt.s32.totalorder %v1305_v6, 111 }
  0x99   : > { %v536_v56 = vsel %vm1553_vm13, %v530_v54, 0.0  ;;  %v539_v57 = vrot.slane %v529_v53, 4  ;;  %v563_v58 = vld [vmem:[#allocation2 + $0x18] sm:$0xff]  ;;  %v562_v60 = vld [vmem:[#allocation2 + $0x10] sm:$0xff]  ;;  %vm581_vm13 = vcmask 1043456  }
  0x9a   : > { %v540_v61 = vrot.slane %v536_v56, 4  ;;  %v1120_v63 = vpack.c.bf16 %v563_v58, %v561_v55  ;;  %v1122_v3 = vpack.c.bf16 %v562_v60, %v560_v59  ;;  %v571_v48 = vld [vmem:[%s1544_s3] sm:$0xf] }
  0x9b   : > { %543 = vst [vmem:[#allocation2 + $0x30] sm:$0xf0] %v539_v57  ;;  %v512_v4 = vpop.permute.xlu1 %511  ;;  %v510_v5 = vpop.permute.xlu0 %509 }
  0x9c   : > { %544 = vst [vmem:[#allocation2 + $0x38] sm:$0xf0] %v540_v61  ;;  %v514_v8 = vsel %vm513_vm14, %v510_v5, %v512_v4  ;;  %v515_v9 = vsel %vm513_vm14, %v512_v4, %v510_v5  ;;  %1121 = vmatprep.subr.bf16.mxu0 %v1120_v63  ;;  %1129 = vmatprep.subr.bf16.mxu1 %v1120_v63 }
  0x9d   : > { %v520_v10 = vsel %vm1314_vm2, %v514_v8, 0.0  ;;  %v521_v11 = vsel %vm1401_vm15, %v515_v9, 0.0  ;;  %1123 = vmatpush1.bf16.msra.mxu0 %v1122_v3  ;;  %1131 = vmatpush1.bf16.msra.mxu1 %v1122_v3 }
  0x9e   : > { %522 = vst [vmem:[#allocation2 + $0x30] sm:$0xf] %v520_v10  ;;  %523 = vst [vmem:[#allocation2 + $0x38] sm:$0xf] %v521_v11 }
  0x9f   : > { %v548_v13 = vpop.permute.xlu1 %547  ;;  %v546_v15 = vpop.permute.xlu0 %545  ;;  %v565_v22 = vld [vmem:[#allocation2 + $0x28] sm:$0xff]  ;;  %v564_v25 = vld [vmem:[#allocation2 + $0x20] sm:$0xff] }
  0xa0   : > { %v550_v16 = vsel %vm1554_vm12, %v546_v15, %v548_v13  ;;  %v551_v17 = vsel %vm1554_vm12, %v548_v13, %v546_v15  ;;  %vm577_vm12 = vcmask 293888  }
  0xa1   : > { %v556_v18 = vsel %vm1338_vm7, %v550_v16, 0.0  ;;  %v557_v19 = vsel %vm1418_vm3, %v551_v17, 0.0 }
  0xa2   : > { %558 = vst [vmem:[#allocation2 + $0x40] sm:$0xf] %v556_v18  ;;  %559 = vst [vmem:[#allocation2 + $0x48] sm:$0xf] %v557_v19 }
  0xa5   : > { %v567_v23 = vld [vmem:[#allocation2 + $0x38] sm:$0xff]  ;;  %v566_v26 = vld [vmem:[#allocation2 + $0x30] sm:$0xff] }
  0xa6   : > { %v1124_v27 = vpack.c.bf16 %v567_v23, %v565_v22  ;;  %v1126_v28 = vpack.c.bf16 %v566_v26, %v564_v25 }
  0xa8   : > { %1125 = vmatprep.subr.bf16.mxu0 %v1124_v27  ;;  %1133 = vmatprep.subr.bf16.mxu1 %v1124_v27 }
  0xa9   : > { %1127 = vmatpush1.bf16.msra.mxu0 %v1126_v28  ;;  %1135 = vmatpush1.bf16.msra.mxu1 %v1126_v28  ;;  %v569_v29 = vld [vmem:[#allocation2 + $0x48] sm:$0xf]  ;;  %v568_v30 = vld [vmem:[#allocation2 + $0x40] sm:$0xf] }
  0xaa   : > { %1105 = vmatprep.subr.msk.mxu0 %vm581_vm13, %v569_v29  ;;  %1108 = vmatprep.subr.msk.mxu1 %vm581_vm13, %v569_v29 }
  0xad   : > { %1106 = vmatpush1.msk.msra.mxu0 %vm581_vm13, %v568_v30  ;;  %1109 = vmatpush1.msk.msra.mxu1 %vm581_vm13, %v568_v30 }
  0xae   : > { %1110 = vmatmul.mubr.msk.f32.vlgmr.msra.gmra.mrb[0].mxu1 %vm577_vm12, %v659_v31  ;;  %1107 = vmatmul.mubr.msk.f32.vlgmr.msra.gmra.mrb[0].mxu0 %vm577_vm12, %v570_v46 }
  0xaf   : > { %966 = vmatprep.mubr.f32.mxu0 %v1193_v2 }
  0xb0   : > { %v664_v33 = vpop.permute.xlu0 %663 }
 0x181   : > { %v735_v34 = vpop.f32.mrb[0].mxu1  ;;  %v654_v12 = vpop.f32.mrb[0].mxu0 }
 0x182   : > { %v736_v38 = vadd.f32 %v735_v34, %v664_v33  ;;  %v737_v39 = vpop.f32.mrb[1].mxu1 }
 0x183   : > { %v738_v40 = vadd.f32 %v737_v39, %v664_v33 }
 0x184   : > { %v743_v41 = vadd.f32 %v736_v38, %v367_v32 }
 0x185   : > { %v744_v42 = vadd.f32 %v741_v37, %v738_v40 }
 0x186   : > { %794 = vrot.lane.b32.xlu0 %v743_v41, %s1186_s16  ;;  %776 = vrot.lane.b32.xlu1 %v743_v41, %s1188_s18  ;;  %v810_v43 = vrot.slane %v743_v41, 4 }
 0x187   : > { %v747_v44 = vcombine.low %v743_v41, %v744_v42  ;;  %v811_v45 = vrot.slane %v744_v42, 4 }
 0x188   : > { %814 = vst [vmem:[#allocation3 + $0x10] sm:$0x70] %v810_v43 }
 0x189   : > { %749 = vst [vmem:[%s365_s13] sm:$0x77] %v747_v44  ;;  %815 = vst [vmem:[#allocation3 + $0x18] sm:$0x70] %v811_v45 }
 0x18a   : > { %816 = vrot.lane.b32.xlu0 %v743_v41, %s1189_s19  ;;  %778 = vrot.lane.b32.xlu1 %v744_v42, %s1188_s18 }
 0x18e   : > { %760 = vrot.lane.b32.xlu0 %v743_v41, %s1185_s15  ;;  %796 = vrot.lane.b32.xlu1 %v744_v42, %s1186_s16 }
 0x192   : > { %750 = vrot.lane.b32.xlu0 %v743_v41, %s1187_s17  ;;  %818 = vrot.lane.b32.xlu1 %v744_v42, %s1189_s19 }
 0x196   : > { %834 = vrot.lane.b32.xlu0 %v743_v41, %s1191_s21  ;;  %762 = vrot.lane.b32.xlu1 %v744_v42, %s1185_s15 }
 0x19a   : > { %850 = vrot.lane.b32.xlu0 %v743_v41, %s1190_s20  ;;  %752 = vrot.lane.b32.xlu1 %v744_v42, %s1187_s17 }
 0x19e   : > { %866 = vrot.lane.b32.xlu0 %v743_v41, %s1192_s22  ;;  %836 = vrot.lane.b32.xlu1 %v744_v42, %s1191_s21 }
 0x1a2   : > { %888 = vperm.xlu0 %1165, %v885_v47   ;;  %852 = vrot.lane.b32.xlu1 %v744_v42, %s1190_s20 }
 0x1a6   : > { %868 = vrot.lane.b32.xlu1 %v744_v42, %s1192_s22 }
 0x1aa   : > { %574 = vperm.xlu1 %1166, %v571_v48  }
 0x1f8   : > { %v795_v49 = vpop.permute.xlu0 %794  ;;  %v777_v2 = vpop.permute.xlu1 %776 }
 0x1fc   : > { %v817_v50 = vpop.permute.xlu0 %816  ;;  %v779_v51 = vpop.permute.xlu1 %778 }
 0x1fd   : > { %v780_v52 = vsel %vm454_vm8, %v777_v2, %v779_v51  ;;  %v781_v53 = vsel %vm454_vm8, %v779_v51, %v777_v2 }
 0x1fe   : > { %v782_v54 = vsel %vm1367_vm10, %v781_v53, 0.0  ;;  %v783_v55 = vsel %vm1359_vm9, %v780_v52, 0.0  ;;  %vm1195_vm10 = vmmov 1  }
 0x1ff   : > { %v786_v56 = vrot.slane %v782_v54, 2  ;;  %v787_v57 = vrot.slane %v783_v55, 2 }
 0x200   : > { %v761_v58 = vpop.permute.xlu0 %760  ;;  %v797_v59 = vpop.permute.xlu1 %796 }
 0x201   : > { %790 = vst [vmem:[#allocation3 + $0x10] ss:$-12 sps:$4 sm:$0xc1] %v786_v56   ;;  %791 = vst [vmem:[#allocation3 + $0x18] ss:$-12 sps:$4 sm:$0xc1] %v787_v57   ;;  %v798_v60 = vsel %vm469_vm4, %v795_v49, %v797_v59  ;;  %v799_v61 = vsel %vm469_vm4, %v797_v59, %v795_v49 }
 0x202   : > { %v800_v63 = vsel %vm1314_vm2, %v799_v61, 0.0  ;;  %v801_v36 = vsel %vm1326_vm5, %v798_v60, 0.0  ;;  %vm1571_vm4 = vcmp.lt.s32.totalorder %v1305_v6, 17 }
 0x203   : > { %v804_v3 = vrot.slane %v800_v63, 7  ;;  %v805_v4 = vrot.slane %v801_v36, 7  ;;  %vm1572_vm8 = vmmov %vm1571_vm4 }
 0x204   : > { %v819_v5 = vpop.permute.xlu1 %818  ;;  %v751_v10 = vpop.permute.xlu0 %750 }
 0x205   : > { %808 = vst [vmem:[#allocation3 + $0x10] sm:$0xe] %v804_v3  ;;  %809 = vst [vmem:[#allocation3 + $0x18] sm:$0xe] %v805_v4  ;;  %v820_v8 = vsel %vm492_vm11, %v817_v50, %v819_v5  ;;  %v821_v9 = vsel %vm492_vm11, %v819_v5, %v817_v50 }
 0x206   : > { %v822_v11 = vsel %vm1338_vm7, %v820_v8, 0.0  ;;  %v823_v13 = vsel %vm1359_vm9, %v821_v9, 0.0  ;;  %vm895_vm9 = vcmask 1042432  }
 0x207   : > { %v826_v15 = vrot.slane %v822_v11, 1  ;;  %v827_v16 = vrot.slane %v823_v13, 1  ;;  %vm1141_vm11 = vmpackc.low %vm895_vm9, %vm1195_vm10 }
 0x208   : > { %v763_v17 = vpop.permute.xlu1 %762  ;;  %v835_v26 = vpop.permute.xlu0 %834 }
 0x209   : > { %830 = vst [vmem:[#allocation3 + $0x20] ss:$-12 sps:$4 sm:$0x83] %v826_v15   ;;  %831 = vst [vmem:[#allocation3 + $0x28] ss:$-12 sps:$4 sm:$0x83] %v827_v16   ;;  %v764_v18 = vsel %vm433_vm0, %v761_v58, %v763_v17  ;;  %v765_v19 = vsel %vm433_vm0, %v763_v17, %v761_v58 }
 0x20a   : > { %v766_v22 = vsel %vm399_vm1, %v765_v19, 0.0  ;;  %v771_v23 = vrot.slane %v764_v18, 5  ;;  %vm1573_vm0 = vcmp.lt.s32.totalorder %v1305_v6, 112  ;;  %v656_v58 = vpop.f32.mrb[1].mxu0 }
 0x20b   : > { %v770_v25 = vrot.slane %v766_v22, 5  ;;  %vm1574_vm1 = vmmov %vm1573_vm0 }
 0x20c   : > { %775 = vst [vmem:[#allocation3 + $0x8] sm:$0x38] %v771_v23  ;;  %v753_v35 = vpop.permute.xlu1 %752  ;;  %v851_v34 = vpop.permute.xlu0 %850 }
 0x20d   : > { %774 = vst [vmem:[#allocation3] sm:$0x38] %v770_v25  ;;  %v754_v27 = vsel %vm1571_vm4, %v751_v10, %v753_v35  ;;  %v755_v28 = vsel %vm1572_vm8, %v753_v35, %v751_v10 }
 0x20e   : > { %v756_v29 = vsel %vm1334_vm6, %v755_v28, 0.0  ;;  %v757_v30 = vsel %vm1326_vm5, %v754_v27, 0.0  ;;  %vm1575_vm5 = vcmp.lt.s32.totalorder %v1308_v7, 240 }
 0x20f   : > { %758 = vst [vmem:[#allocation3] sm:$0x7] %v756_v29  ;;  %759 = vst [vmem:[#allocation3 + $0x8] sm:$0x7] %v757_v30 }
 0x210   : > { %v837_v31 = vpop.permute.xlu1 %836  ;;  %v879_v42 = vld [vmem:[#allocation3 + $0x18] sm:$0xff]  ;;  %v878_v62 = vld [vmem:[#allocation3 + $0x10] sm:$0xff]  ;;  %v867_v49 = vpop.permute.xlu0 %866 }
 0x211   : > { %v838_v32 = vsel %vm513_vm14, %v835_v26, %v837_v31  ;;  %v839_v33 = vsel %vm513_vm14, %v837_v31, %v835_v26 }
 0x212   : > { %v840_v37 = vsel %vm1314_vm2, %v838_v32, 0.0  ;;  %v841_v21 = vsel %vm1401_vm15, %v839_v33, 0.0  ;;  %vm1576_vm2 = vcmp.lt.s32.totalorder %v1305_v6, 111 }
 0x213   : > { %v844_v38 = vrot.slane %v840_v37, 6  ;;  %v845_v39 = vrot.slane %v841_v21, 6  ;;  %vm1577_vm6 = vmmov %vm1576_vm2 }
 0x214   : > { %v853_v20 = vpop.permute.xlu1 %852 }
 0x215   : > { %848 = vst [vmem:[#allocation3 + $0x20] sm:$0x1c] %v844_v38  ;;  %849 = vst [vmem:[#allocation3 + $0x28] sm:$0x1c] %v845_v39  ;;  %v854_v40 = vsel %vm1573_vm0, %v851_v34, %v853_v20  ;;  %v855_v41 = vsel %vm1574_vm1, %v853_v20, %v851_v34 }
 0x216   : > { %v857_v43 = vsel %vm1575_vm5, %v855_v41, 0.0  ;;  %v860_v14 = vrot.slane %v854_v40, 3  ;;  %v877_v44 = vld [vmem:[#allocation3 + $0x8] sm:$0xff]  ;;  %v876_v45 = vld [vmem:[#allocation3] sm:$0xff] }
 0x217   : > { %v861_v46 = vrot.slane %v857_v43, 3  ;;  %v1136_v47 = vpack.c.bf16 %v879_v42, %v877_v44  ;;  %v1138_v48 = vpack.c.bf16 %v878_v62, %v876_v45 }
 0x218   : > { %864 = vst [vmem:[#allocation3 + $0x20] sm:$0xe0] %v860_v14  ;;  %v869_v2 = vpop.permute.xlu1 %868 }
 0x219   : > { %865 = vst [vmem:[#allocation3 + $0x28] sm:$0xe0] %v861_v46  ;;  %v870_v50 = vsel %vm1576_vm2, %v867_v49, %v869_v2  ;;  %v871_v51 = vsel %vm1577_vm6, %v869_v2, %v867_v49  ;;  %1137 = vmatprep.subr.bf16.mxu0 %v1136_v47 }
 0x21a   : > { %v872_v7 = vsel %vm1338_vm7, %v870_v50, 0.0  ;;  %v873_v52 = vsel %vm1418_vm3, %v871_v51, 0.0  ;;  %1139 = vmatpush1.bf16.msra.mxu0 %v1138_v48  ;;  %vm891_vm7 = vcmask 220160  }
 0x21b   : > { %874 = vst [vmem:[#allocation3 + $0x30] sm:$0x7] %v872_v7  ;;  %875 = vst [vmem:[#allocation3 + $0x38] sm:$0x7] %v873_v52 }
 0x21f   : > { %v880_v53 = vld [vmem:[#allocation3 + $0x20] sm:$0xff] }
 0x220   : > { %v881_v54 = vld [vmem:[#allocation3 + $0x28] sm:$0xff] }
 0x221   : > { %v889_v59 = vpop.permute.xlu0 %888 }
 0x222   : > { %v883_v55 = vld [vmem:[#allocation3 + $0x38] sm:$0x7]  ;;  %v882_v56 = vld [vmem:[#allocation3 + $0x30] sm:$0x7] }
 0x223   : > { %v1140_v57 = vpack.c.bf16 %v883_v55, %v881_v54  ;;  %v1143_v6 = vpack.c.bf16 %v882_v56, %v880_v53 }
 0x225   : > { %1142 = vmatprep.subr.msk.bf16.mxu0 %vm1141_vm11, %v1140_v57 }
 0x226   : > { %1145 = vmatpush1.bf16.msk.msra.mxu0 %vm1141_vm11, %v1143_v6 }
 0x229   : > { %1113 = vmatmul.mubr.msk.f32.vlgmr.msra.gmra.mrb[2].mxu0 %vm891_vm7, %v884_v24  ;;  %v575_v15 = vpop.permute.xlu1 %574 }
 0x22a   : > { %v655_v16 = vadd.f32 %v654_v12, %v575_v15  ;;  %v657_v18 = vadd.f32 %v656_v58, %v575_v15 }
 0x2fc   : > { %v968_v60 = vpop.f32.mrb[2].mxu0 }
 0x2fd   : > { %v969_v61 = vadd.f32 %v968_v60, %v889_v59  ;;  %v970_v63 = vpop.f32.mrb[3].mxu0 }
 0x2fe   : > { %v971_v36 = vadd.f32 %v970_v63, %v889_v59 }
 0x2ff   : > { %v973_v3 = vsub.f32 0.0, %v969_v61 }
 0x300   : > { %v974_v4 = vsub.f32 0.0, %v971_v36 }
 0x301   : > { %v975_v5 = vmul.f32 1.442695, %v973_v3 }
 0x302   : > { %v977_v8 = vmul.f32 1.442695, %v974_v4 }
 0x303   : > { %1169 = vpow2.f32 %v975_v5 }
 0x304   : > { %1171 = vpow2.f32 %v977_v8 }
 0x30d   : > { %v1170_v9 = vpop.eup %1169 }
 0x30e   : > { %v1172_v10 = vpop.eup %1171  ;;  %v979_v11 = vadd.f32 1.0, %v1170_v9 }
 0x30f   : > { %v980_v13 = vadd.f32 1.0, %v1172_v10 }
 0x310   : > { %1173 = vrcp.f32 %v979_v11 }
 0x311   : > { %1175 = vrcp.f32 %v980_v13 }
 0x31a   : > { %v1174_v17 = vpop.eup %1173 }
 0x31b   : > { %v1176_v19 = vpop.eup %1175  ;;  %v983_v22 = vmul.f32 %v1174_v17, %v655_v16 }
 0x31c   : > { %v984_v23 = vmul.f32 %v1176_v19, %v657_v18 }
 0x31d   : > { %v985_v25 = vadd.f32 %v983_v22, %v1260_v0 }
 0x31e   : > { %v986_v26 = vadd.f32 %v984_v23, %v1269_v1 }
 0x320   : > { %v989_v35 = vcombine.low %v985_v25, %v986_v26 }
 0x322   : > { %991 = vst [vmem:[%s360_s24] sm:$0xff] %v989_v35 }
 0x323 PF: > { %s20_s30 = sadd.s32 1, %s1183_s30  }
 0x324   : > { %p17_p4 = scmp.ge.s32.totalorder %s20_s30, 4  }
 0x326   :  { %19 = sbr.rel (!%p17_p4) target bundleno = 1 (0x1), region = 97 }

</bundles_post_ra>
